<compile_context>
chip_gen: v7x
topology: tpu7x:2x2x1
jax: 0.10.0
libtpu: 0.0.40
codegen_flags: <defaults>
</compile_context>

<pallas_src>
import functools

import jax
import jax.numpy as jnp
from jax import lax
from jax.experimental import pallas as pl
from jax.experimental.pallas import tpu as pltpu

_LANES = 640  # lcm(5, 128): one row == 128 whole 5-channel price groups.


def _chunk_partial(x, masks):
    """x: (rows, 640) f32, interleaved [g0c0 g0c1 g0c2 g0c3 g0c4 g1c0 ...].

    Returns a (1, 640) f32 per-lane partial of
        relu(low_of_group - x) + relu(x - high_of_group)
    summed over the chunk's rows.  low = channel 2, high = channel 1.
    """
    m0, m1, m2, m3 = masks
    # pltpu.roll follows jnp.roll semantics: roll(x, s)[j] = x[(j - s) mod n].
    # Shifts are taken mod 640; wrapped lanes are never *selected* because a
    # group's low/high always lives inside the same 5-lane group of the row.
    r_m2 = pltpu.roll(x, 638, axis=1)  # value at lane j == x[j + 2]
    r_m1 = pltpu.roll(x, 639, axis=1)  # == x[j + 1]
    r_p1 = pltpu.roll(x, 1, axis=1)    # == x[j - 1]
    r_p2 = pltpu.roll(x, 2, axis=1)    # == x[j - 2]
    r_p3 = pltpu.roll(x, 3, axis=1)    # == x[j - 3]
    # low_vec[j]  = x[group_start + 2]   (channel index of lane j is j % 5)
    # high_vec[j] = x[group_start + 1]
    low = jnp.where(m0, r_m2,
          jnp.where(m1, r_m1,
          jnp.where(m2, x,
          jnp.where(m3, r_p1, r_p2))))
    high = jnp.where(m0, r_m1,
           jnp.where(m1, x,
           jnp.where(m2, r_p1,
           jnp.where(m3, r_p2, r_p3))))
    contrib = jnp.maximum(low - x, 0.0) + jnp.maximum(x - high, 0.0)
    return jnp.sum(contrib, axis=0, keepdims=True)


def _process_rows(x_ref, out_ref, masks, valid_rows, chunk_rows):
    """Accumulate the partial sums of the first `valid_rows` (static) rows."""
    n_full, rem = divmod(valid_rows, chunk_rows)
    if n_full > 0:
        @pl.loop(0, n_full)
        def _(i):
            start = pl.multiple_of(i * chunk_rows, chunk_rows)
            x = x_ref[pl.ds(start, chunk_rows), :].astype(jnp.float32)
            out_ref[...] += _chunk_partial(x, masks)
    if rem > 0:
        # Static tail slice inside the tile: never touches the block's padded
        # (garbage) rows, so no per-element masking is ever needed.
        x = x_ref[pl.ds(n_full * chunk_rows, rem), :].astype(jnp.float32)
        out_ref[...] += _chunk_partial(x, masks)


def _price_constraint_kernel(x_ref, out_ref, *, num_tiles, rows_per_tile,
                             tail_rows, chunk_rows):
    out_ref[...] = jnp.zeros_like(out_ref)
    # Channel index of each lane within a 640-lane row (identical for every
    # row/block because rows are whole groups).  Tiny (1, 640) one-time cost.
    ch = lax.broadcasted_iota(jnp.int32, (1, _LANES), 1) % 5
    masks = tuple(ch == c for c in range(4))

    if num_tiles == 1:
        _process_rows(x_ref, out_ref, masks, tail_rows, chunk_rows)
    elif tail_rows == rows_per_tile:
        # Every tile is full: single unconditional path, zero masking cost.
        _process_rows(x_ref, out_ref, masks, rows_per_tile, chunk_rows)
    else:
        last = num_tiles - 1

        @pl.when(pl.program_id(0) != last)
        def _():
            _process_rows(x_ref, out_ref, masks, rows_per_tile, chunk_rows)

        @pl.when(pl.program_id(0) == last)
        def _():
            _process_rows(x_ref, out_ref, masks, tail_rows, chunk_rows)


def price_constraint_entropy_loss(prices, cont_loss_weight=1.0, *,
                                  block_rows=4096, chunk_rows=8):
    """prices: (N, T, S, 5). Returns {'weighted_cont_loss': scalar f32}.

    block_rows: rows (of 128 groups / 640 elems) per pipelined grid step.
                Default 4096 rows ~= 10 MiB f32 per buffer (20 MiB double
                buffered) — amortizes the ~0.35 us per-step overhead on
                v5e/v6e/v7x while staying far below v7x's 64 MiB VMEM.
    chunk_rows: rows processed per inner iteration; kept small (8 -> 5 vregs
                per temporary) so the roll/select chain lives in vregs.
    """
    n, t, s, c = prices.shape
    assert c == 5, "last dim must be the 5 price channels"
    m = n * t * s                                # number of price groups
    flat = prices.reshape(-1)                    # zero-copy (contiguous)
    rows = -(-m // 128)                          # rows of 128 groups each
    padded_groups = rows * 128
    if padded_groups != m:
        # Whole zero groups contribute exactly 0 to the sum.
        # TODO(synk): keep N*T*S a multiple of 128 upstream so this pad (the
        # only data copy in the pipeline) disappears.
        flat = jnp.pad(flat, (0, (padded_groups - m) * 5))
    x2d = flat.reshape(rows, _LANES)             # zero-copy reshape

    rows_per_tile = min(block_rows, rows)
    if rows_per_tile < rows:
        assert rows_per_tile % 8 == 0, "block_rows must be a multiple of 8"
    cb = max(1, min(chunk_rows, rows_per_tile))
    num_tiles = -(-rows // rows_per_tile)
    tail_rows = rows - (num_tiles - 1) * rows_per_tile

    kernel = functools.partial(
        _price_constraint_kernel, num_tiles=num_tiles,
        rows_per_tile=rows_per_tile, tail_rows=tail_rows, chunk_rows=cb)

    total_elems = rows * _LANES
    partials = pl.pallas_call(
        kernel,
        out_shape=jax.ShapeDtypeStruct((num_tiles, _LANES), jnp.float32),
        grid_spec=pltpu.PrefetchScalarGridSpec(
            num_scalar_prefetch=0,
            grid=(num_tiles,),
            in_specs=[pl.BlockSpec((rows_per_tile, _LANES), lambda i: (i, 0))],
            out_specs=pl.BlockSpec((1, _LANES), lambda i: (i, 0)),
        ),
        compiler_params=pltpu.CompilerParams(
            # Independent per-tile partials -> parallel (2-TC shardable on v7x).
            dimension_semantics=("parallel",),
            # Covers 20 MiB double-buffered input + small temps; above v5e's
            # 16 MiB default scoped VMEM, below v7x's 64 MiB physical.
            vmem_limit_bytes=48 * 1024 * 1024,
        ),
        cost_estimate=pl.CostEstimate(
            flops=14 * total_elems,
            transcendentals=0,
            bytes_accessed=total_elems * prices.dtype.itemsize
                           + num_tiles * _LANES * 4),
    )(x2d)

    total = jnp.sum(partials)                    # tiny XLA reduce
    constraint_loss = total / jnp.float32(m * 4)  # mean(lower)+mean(upper)

    weighted_cont_loss = constraint_loss
    # Static Python check, mirrors the PyTorch module (weight is a config float).
    if cont_loss_weight is not None and cont_loss_weight > 0.0:
        weighted_cont_loss = jnp.float32(cont_loss_weight) * constraint_loss
    return {"weighted_cont_loss": weighted_cont_loss}


def _reference(prices, cont_loss_weight=1.0):
    # Pure-JAX reference mirroring the PyTorch code literally.
    p = prices.reshape(-1, 5).astype(jnp.float32)
    low = p[:, 2:3]
    others_l = p[:, jnp.array([0, 1, 3, 4])]
    lower_loss = jnp.mean(jnp.maximum(low - others_l, 0.0))
    high = p[:, 1:2]
    others_u = p[:, jnp.array([0, 2, 3, 4])]
    upper_loss = jnp.mean(jnp.maximum(others_u - high, 0.0))
    loss = upper_loss + lower_loss
    if cont_loss_weight is not None and cont_loss_weight > 0.0:
        loss = cont_loss_weight * loss
    return jnp.float32(loss)


if __name__ == "__main__":
    keys = jax.random.split(jax.random.PRNGKey(0), 3)

    # Case 1: single tile; M = 2*8*8 = 128 groups == exactly one 640-lane row.
    p1 = jax.random.uniform(keys[0], (2, 8, 8, 5), dtype=jnp.float32)
    o1 = price_constraint_entropy_loss(p1, cont_loss_weight=1.0)
    l1 = jax.block_until_ready(o1["weighted_cont_loss"])
    r1 = _reference(p1, 1.0)
    assert jnp.allclose(l1, r1, rtol=1e-5, atol=1e-6), (l1, r1)

    # Case 2: multi-tile with a ragged last tile and a zero-padded lane tail.
    # M = 2*10*67 = 1340 -> 11 rows; block_rows=8 -> 2 tiles, last has 3 rows.
    p2 = jax.random.uniform(keys[1], (2, 10, 67, 5), dtype=jnp.float32)
    o2 = price_constraint_entropy_loss(p2, cont_loss_weight=0.5,
                                       block_rows=8, chunk_rows=8)
    l2 = jax.block_until_ready(o2["weighted_cont_loss"])
    r2 = _reference(p2, 0.5)
    assert jnp.allclose(l2, r2, rtol=1e-5, atol=1e-6), (l2, r2)

    # Case 3: multi-tile, all tiles full, fully zero-copy path.
    # M = 4*8*128 = 4096 -> 32 rows; block_rows=16 -> 2 full tiles.
    p3 = jax.random.uniform(keys[2], (4, 8, 128, 5), dtype=jnp.float32)
    o3 = price_constraint_entropy_loss(p3, cont_loss_weight=2.0,
                                       block_rows=16, chunk_rows=8)
    l3 = jax.block_until_ready(o3["weighted_cont_loss"])
    r3 = _reference(p3, 2.0)
    assert jnp.allclose(l3, r3, rtol=1e-5, atol=1e-6), (l3, r3)

    print("KERNEL_OK")
</pallas_src>

<mosaic_0001>
module attributes {stable_mosaic.version = 11 : i64} {
  func.func @_price_constraint_kernel(%arg0: i32, %arg1: memref<1x640xf32, #tpu.memory_space<vmem>>, %arg2: memref<1x640xf32, #tpu.memory_space<vmem>>) attributes {dimension_semantics = [#tpu.dimension_semantics<parallel>], iteration_bounds = array<i64: 1>, scalar_prefetch = 0 : i64, scratch_operands = 0 : i64, tpu.core_type = #tpu.core_type<tc>, window_params = [{transform_indices = @transform_0, window_bounds = array<i64: 1, 640>}, {transform_indices = @transform_1, window_bounds = array<i64: 1, 640>}]} {
    %cst = arith.constant 0.000000e+00 : f32
    %0 = vector.broadcast %cst : f32 to vector<1x640xf32>
    %c0 = arith.constant 0 : index
    %c0_0 = arith.constant 0 : index
    %1 = vector.load %arg2[%c0, %c0_0] : memref<1x640xf32, #tpu.memory_space<vmem>>, vector<1x640xf32>
    tpu.vector_store %arg2[%c0, %c0_0], %0 {strides = array<i32>} : memref<1x640xf32, #tpu.memory_space<vmem>>, vector<1x640xf32>,
    %2 = tpu.iota {dimensions = array<i32: 1>} : vector<1x640xi32>
    %c5_i32 = arith.constant 5 : i32
    %c0_i32 = arith.constant 0 : i32
    %3 = arith.cmpi eq, %c5_i32, %c0_i32 : i32
    %c1_i32 = arith.constant 1 : i32
    %4 = arith.select %3, %c1_i32, %c5_i32 : i32
    %5 = vector.broadcast %4 : i32 to vector<1x640xi32>
    %6 = arith.remsi %2, %5 : vector<1x640xi32>
    %c0_i32_1 = arith.constant 0 : i32
    %7 = vector.broadcast %c0_i32_1 : i32 to vector<1x640xi32>
    %8 = arith.cmpi ne, %6, %7 : vector<1x640xi32>
    %c0_i32_2 = arith.constant 0 : i32
    %9 = vector.broadcast %c0_i32_2 : i32 to vector<1x640xi32>
    %10 = arith.cmpi slt, %6, %9 : vector<1x640xi32>
    %c0_i32_3 = arith.constant 0 : i32
    %11 = arith.cmpi slt, %4, %c0_i32_3 : i32
    %12 = vector.broadcast %11 : i1 to vector<1x640xi1>
    %13 = vector.broadcast %12 : vector<1x640xi1> to vector<1x640xi1>
    %14 = arith.xori %10, %13 : vector<1x640xi1>
    %15 = arith.andi %14, %8 : vector<1x640xi1>
    %16 = vector.broadcast %4 : i32 to vector<1x640xi32>
    %17 = arith.addi %6, %16 : vector<1x640xi32>
    %18 = arith.select %15, %17, %6 : vector<1x640xi1>, vector<1x640xi32>
    %c0_i32_4 = arith.constant 0 : i32
    %19 = vector.broadcast %c0_i32_4 : i32 to vector<1x640xi32>
    %20 = arith.cmpi eq, %18, %19 : vector<1x640xi32>
    %c1_i32_5 = arith.constant 1 : i32
    %21 = vector.broadcast %c1_i32_5 : i32 to vector<1x640xi32>
    %22 = arith.cmpi eq, %18, %21 : vector<1x640xi32>
    %c2_i32 = arith.constant 2 : i32
    %23 = vector.broadcast %c2_i32 : i32 to vector<1x640xi32>
    %24 = arith.cmpi eq, %18, %23 : vector<1x640xi32>
    %c3_i32 = arith.constant 3 : i32
    %25 = vector.broadcast %c3_i32 : i32 to vector<1x640xi32>
    %26 = arith.cmpi eq, %18, %25 : vector<1x640xi32>
    %c0_i32_6 = arith.constant 0 : i32
    %c1_i32_7 = arith.constant 1 : i32
    %27 = arith.muli %c0_i32_6, %c1_i32_7 : i32
    %c0_i32_8 = arith.constant 0 : i32
    %28 = arith.addi %c0_i32_8, %27 : i32
    %c1_i32_9 = arith.constant 1 : i32
    %29 = arith.muli %28, %c1_i32_9 : i32
    %30 = tpu.assume_multiple %29, 1 : i32
    %31 = arith.index_cast %30 : i32 to index
    %c0_10 = arith.constant 0 : index
    %32 = vector.load %arg1[%31, %c0_10] : memref<1x640xf32, #tpu.memory_space<vmem>>, vector<1x640xf32>
    %c0_11 = arith.constant 0 : index
    %c0_12 = arith.constant 0 : index
    %33 = vector.load %arg2[%c0_11, %c0_12] : memref<1x640xf32, #tpu.memory_space<vmem>>, vector<1x640xf32>
    %c638_i32 = arith.constant 638 : i32
    %34 = tpu.dynamic_rotate %32 by %c638_i32 dim 1 : vector<1x640xf32>, i32 -> vector<1x640xf32>
    %c639_i32 = arith.constant 639 : i32
    %35 = tpu.dynamic_rotate %32 by %c639_i32 dim 1 : vector<1x640xf32>, i32 -> vector<1x640xf32>
    %c1_i32_13 = arith.constant 1 : i32
    %36 = tpu.dynamic_rotate %32 by %c1_i32_13 dim 1 : vector<1x640xf32>, i32 -> vector<1x640xf32>
    %c2_i32_14 = arith.constant 2 : i32
    %37 = tpu.dynamic_rotate %32 by %c2_i32_14 dim 1 : vector<1x640xf32>, i32 -> vector<1x640xf32>
    %c3_i32_15 = arith.constant 3 : i32
    %38 = tpu.dynamic_rotate %32 by %c3_i32_15 dim 1 : vector<1x640xf32>, i32 -> vector<1x640xf32>
    %39 = arith.select %26, %36, %37 : vector<1x640xi1>, vector<1x640xf32>
    %40 = arith.select %24, %32, %39 : vector<1x640xi1>, vector<1x640xf32>
    %41 = arith.select %22, %35, %40 : vector<1x640xi1>, vector<1x640xf32>
    %42 = arith.select %20, %34, %41 : vector<1x640xi1>, vector<1x640xf32>
    %43 = arith.select %26, %37, %38 : vector<1x640xi1>, vector<1x640xf32>
    %44 = arith.select %24, %36, %43 : vector<1x640xi1>, vector<1x640xf32>
    %45 = arith.select %22, %32, %44 : vector<1x640xi1>, vector<1x640xf32>
    %46 = arith.select %20, %35, %45 : vector<1x640xi1>, vector<1x640xf32>
    %47 = arith.subf %42, %32 : vector<1x640xf32>
    %cst_16 = arith.constant 0.000000e+00 : f32
    %48 = vector.broadcast %cst_16 : f32 to vector<1x640xf32>
    %49 = arith.maximumf %47, %48 : vector<1x640xf32>
    %50 = arith.subf %32, %46 : vector<1x640xf32>
    %cst_17 = arith.constant 0.000000e+00 : f32
    %51 = vector.broadcast %cst_17 : f32 to vector<1x640xf32>
    %52 = arith.maximumf %50, %51 : vector<1x640xf32>
    %53 = arith.addf %49, %52 : vector<1x640xf32>
    %cst_18 = arith.constant dense<0.000000e+00> : vector<640xf32>
    %54 = vector.multi_reduction <add>, %53, %cst_18 [0] : vector<1x640xf32> to vector<640xf32>
    %55 = vector.shape_cast %54 : vector<640xf32> to vector<1x640xf32>
    %56 = arith.addf %33, %55 : vector<1x640xf32>
    %c0_19 = arith.constant 0 : index
    %c0_20 = arith.constant 0 : index
    %57 = vector.load %arg2[%c0_19, %c0_20] : memref<1x640xf32, #tpu.memory_space<vmem>>, vector<1x640xf32>
    tpu.vector_store %arg2[%c0_19, %c0_20], %56 {strides = array<i32>} : memref<1x640xf32, #tpu.memory_space<vmem>>, vector<1x640xf32>,
    %c1_i32_21 = arith.constant 1 : i32
    return
  }
  func.func @transform_0(%arg0: i32) -> (i32, i32) {
    %c0_i32 = arith.constant 0 : i32
    %c0_i32_0 = arith.constant 0 : i32
    return %arg0, %c0_i32 : i32, i32
  }
  func.func @transform_1(%arg0: i32) -> (i32, i32) {
    %c0_i32 = arith.constant 0 : i32
    %c0_i32_0 = arith.constant 0 : i32
    return %arg0, %c0_i32 : i32, i32
  }
}

</mosaic_0001>

<bundles_post_ra>
// kernel: tpu_custom_call.1
= control target key start
LH: loop header
LB: loop body
LE: loop exit
PB: predicated region body
PF: predicated region fallthrough
CT: control target
= control target key end

     0   :  { %6 = vsyncpa [#allocation3], 0  ;;  %s880_s0 = inlined_call_operand.hbm [shape: f32[1,640], index: 0, kind: input, shape index: {}]   ;;  %s881_s1 = inlined_call_operand.hbm [shape: f32[1,640], index: 1, kind: output, shape index: {}]  }
   0x1   :  { %7 = vsyncpa [#allocation4], 0  ;;  %s504_s6 = smov [#allocation2]   ;;  %s456_s10 = scalar_lea.hbm %s880_s0, 80 }
   0x2   :  { %s14_s7 = sshll.u32 %s504_s6, 4  ;;  %p457_p0 = scmp.ne.s32.totalorder %s880_s0, %s456_s10  ;;  %s15_s7 = int_to_ptr.vmem [resolvable:$true] %s14_s7 }
   0x3   :  { %p460_p1 = scmp.lt.u32.totalorder %s456_s10, %s880_s0 }
   0x5   :  { %p462_p2 = pnand %p460_p1, %p457_p0 }
   0x7   :  { %465 = shalt.err (!%p462_p2)
}
   0x8   :  { %s466_s15 = scalar_lea.vmem %s15_s7, 80  ;;  %s470_s16 = scalar_lea.vmem %s15_s7, 96 }
   0x9   :  { %p467_p3 = scmp.ne.s32.totalorder %s15_s7, %s466_s15  ;;  %p471_p4 = scmp.lt.s32.totalorder %s15_s7, %s15_s7 }
   0xa   :  { %p472_p5 = scmp.lt.s32.totalorder %s470_s16, %s466_s15 }
   0xc   :  { %p473_p6 = por %p472_p5, %p471_p4 }
   0xe   :  { %p474_p7 = pnand %p473_p6, %p467_p3 }
  0x10   :  { %477 = shalt.err (!%p474_p7)
}
  0x11   :  { %17 = dma.hbm_to_vmem [thread:$0]  %s880_s0, 80, %s15_s7, [#allocation3]  }
  0x12   :  { %500 = dma.done.wait [#allocation3], 80  }
  0x13   :  { %501 = vsyncadd [#allocation3], 4294967216  ;;  %v21_v0 = vlaneseq  ;;  %v505_v3 = vmov 0.0   ;;  %v547_v8 = vld [vmem:[#allocation2] sm:$0x1f]  ;;  %s506_s0 = smov 2  }
  0x14   :  { %s507_s19 = smov 3   ;;  %s508_s20 = smov 1   ;;  %v511_v53 = vmov 1966171168  }
  0x15   :  { %vm535_vm0 = vcmp.lt.s32.totalorder %v21_v0, 640  ;;  %v539_v2 = vshrl.u32 %v21_v0, 7  ;;  %s509_s21 = smov 127   ;;  %s510_s22 = smov 126   ;;  %v600_v15 = vand.u32 127, %v21_v0  ;;  %v300_v54 = vunpack.c.l.s4 %v511_v53 }
  0x16   :  { %25 = vst.msk [vmem:[#allocation5] sm:$0x1f] %vm535_vm0, %v505_v3  ;;  %s512_s23 = smov [#allocation5]  }
  0x17   :  { %v147_v4 = vsub.s32 2, %v539_v2  ;;  %v139_v5 = vsub.s32 0, %v539_v2  ;;  %v151_v6 = vsub.s32 3, %v539_v2  ;;  %v143_v7 = vsub.s32 1, %v539_v2  ;;  %s428_s24 = sshll.u32 %s512_s23, 4  ;;  %s429_s24 = int_to_ptr.vmem [resolvable:$true] %s428_s24 }
  0x18   :  { %v155_v13 = vsub.s32 4, %v539_v2  ;;  %v28_v16 = vadd.s32 128, %v600_v15  ;;  %v29_v17 = vadd.s32 256, %v600_v15  ;;  %v30_v18 = vadd.s32 384, %v600_v15  ;;  %s478_s25 = scalar_lea.vmem %s429_s24, 80  ;;  %s482_s26 = scalar_lea.vmem %s429_s24, 96 }
  0x19   :  { %v552_v9 = vrot.slane %v547_v8, %v147_v4  ;;  %v557_v10 = vrot.slane %v547_v8, %v139_v5  ;;  %v564_v11 = vrot.slane %v547_v8, %v151_v6  ;;  %v569_v12 = vrot.slane %v547_v8, %v143_v7  ;;  %p479_p8 = scmp.ne.s32.totalorder %s429_s24, %s478_s25  ;;  %p483_p9 = scmp.lt.s32.totalorder %s429_s24, %s429_s24 }
  0x1a   :  { %v577_v14 = vrot.slane %v547_v8, %v155_v13  ;;  %v606_v19 = vmul.u32.u64.low 3435973837, %v600_v15  ;;  %v607_v20 = vmul.u32.u64.high 3435973837, %v600_v15, %v606_v19  ;;  %v31_v21 = vadd.s32 512, %v600_v15  ;;  %p484_p10 = scmp.lt.s32.totalorder %s482_s26, %s478_s25 }
  0x1b   :  { %214 = vrot.lane.b32.xlu1 %v552_v9, %s506_s0  ;;  %210 = vrot.lane.b32.xlu0 %v557_v10, %s506_s0  ;;  %v610_v22 = vmul.u32.u64.low 3435973837, %v28_v16  ;;  %v611_v23 = vmul.u32.u64.high 3435973837, %v28_v16, %v610_v22  ;;  %v613_v24 = vmul.u32.u64.low 3435973837, %v29_v17  ;;  %v614_v25 = vmul.u32.u64.high 3435973837, %v29_v17, %v613_v24 }
  0x1c   :  { %v616_v26 = vmul.u32.u64.low 3435973837, %v30_v18  ;;  %v617_v27 = vmul.u32.u64.high 3435973837, %v30_v18, %v616_v26  ;;  %v619_v28 = vmul.u32.u64.low 3435973837, %v31_v21  ;;  %v620_v29 = vmul.u32.u64.high 3435973837, %v31_v21, %v619_v28  ;;  %p485_p11 = por %p484_p10, %p483_p9 }
  0x1d   :  { %v38_v32 = vshrl.u32 %v607_v20, 2  ;;  %v49_v33 = vshrl.u32 %v611_v23, 2  ;;  %v60_v34 = vshrl.u32 %v614_v25, 2  ;;  %v301_v61 = vunpack.c.0.s8 %v300_v54 }
  0x1e   :  { %v71_v37 = vshrl.u32 %v617_v27, 2  ;;  %v82_v39 = vshrl.u32 %v620_v29, 2  ;;  %p486_p12 = pnand %p485_p11, %p479_p8 }
  0x1f   :  { %216 = vrot.lane.b32.xlu1 %v564_v11, %s506_s0  ;;  %212 = vrot.lane.b32.xlu0 %v569_v12, %s506_s0  ;;  %v39_v38 = vmul.u32 5, %v38_v32  ;;  %v50_v40 = vmul.u32 5, %v49_v33  ;;  %v655_v19 = vsub.s32 %v301_v61, %v539_v2  ;;  %v135_v2 = vld [vmem:[#allocation5] sm:$0x1f] }
  0x20   :  { %v61_v41 = vmul.u32 5, %v60_v34  ;;  %v72_v44 = vmul.u32 5, %v71_v37 }
  0x21   :  { %v40_v45 = vsub.s32 %v600_v15, %v39_v38  ;;  %v83_v46 = vmul.u32 5, %v82_v39  ;;  %v51_v47 = vsub.s32 %v28_v16, %v50_v40 }
  0x22   :  { %v62_v48 = vsub.s32 %v29_v17, %v61_v41  ;;  %v73_v51 = vsub.s32 %v30_v18, %v72_v44 }
  0x23   :  { %226 = vrot.lane.b32.xlu1 %v557_v10, %s507_s19  ;;  %218 = vrot.lane.b32.xlu0 %v577_v14, %s506_s0  ;;  %vm87_vm1 = vcmp.ne.s32.totalorder %v40_v45, 0  ;;  %vm92_vm2 = vcmp.lt.s32.totalorder %v40_v45, 0  ;;  %v84_v52 = vsub.s32 %v31_v21, %v83_v46  ;;  %vm88_vm3 = vcmp.ne.s32.totalorder %v51_v47, 0 }
  0x24   :  { %vm93_vm4 = vcmp.lt.s32.totalorder %v51_v47, 0  ;;  %vm89_vm5 = vcmp.ne.s32.totalorder %v62_v48, 0  ;;  %vm94_vm6 = vcmp.lt.s32.totalorder %v62_v48, 0  ;;  %v103_v55 = vadd.s32 5, %v51_v47  ;;  %vm642_vm7 = vmand %vm92_vm2, %vm87_vm1 }
  0x25   :  { %v102_v57 = vadd.s32 5, %v40_v45  ;;  %vm90_vm8 = vcmp.ne.s32.totalorder %v73_v51, 0  ;;  %vm95_vm9 = vcmp.lt.s32.totalorder %v73_v51, 0  ;;  %vm98_vm10 = vmand %vm93_vm4, %vm88_vm3  ;;  %v104_v60 = vadd.s32 5, %v62_v48 }
  0x26   :  { %vm91_vm11 = vcmp.ne.s32.totalorder %v84_v52, 0  ;;  %vm96_vm12 = vcmp.lt.s32.totalorder %v84_v52, 0  ;;  %vm99_vm13 = vmand %vm94_vm6, %vm89_vm5  ;;  %v105_v62 = vadd.s32 5, %v73_v51  ;;  %v106_v63 = vadd.s32 5, %v84_v52 }
  0x27   :  { %230 = vrot.lane.b32.xlu1 %v552_v9, %s507_s19  ;;  %228 = vrot.lane.b32.xlu0 %v569_v12, %s507_s19  ;;  %vm100_vm14 = vmand %vm95_vm9, %vm90_vm8  ;;  %v646_v0 = vsel %vm98_vm10, %v103_v55, %v51_v47  ;;  %v650_v3 = vsel %vm642_vm7, %v102_v57, %v40_v45  ;;  %v652_v18 = vsel %vm99_vm13, %v104_v60, %v62_v48  ;;  %vm220_vm1 = vcmp.lt.s32.totalorder %v600_v15, 2 }
  0x28   :  { %vm101_vm15 = vmand %vm96_vm12, %vm91_vm11  ;;  %vm236_vm2 = vcmp.lt.s32.totalorder %v600_v15, 3  ;;  %v659_v20 = vsel %vm100_vm14, %v105_v62, %v73_v51  ;;  %vm128_vm3 = vcmp.eq.s32.totalorder %v646_v0, 3  ;;  %vm882_vm4 = vcmp.eq.s32.totalorder %v650_v3, 3 }
  0x29   :  { %v663_v21 = vsel %vm101_vm15, %v106_v63, %v84_v52  ;;  %vm204_vm5 = vcmp.lt.s32.totalorder %v600_v15, 1  ;;  %vm123_vm7 = vcmp.eq.s32.totalorder %v646_v0, 2  ;;  %vm884_vm9 = vcmp.eq.s32.totalorder %v646_v0, 1 }
  0x2a   :  { %vm122_vm12 = vcmp.eq.s32.totalorder %v650_v3, 2  ;;  %vm131_vm13 = vcmp.eq.s32.totalorder %v663_v21, 3  ;;  %vm883_vm14 = vcmp.eq.s32.totalorder %v663_v21, 2  ;;  %vm121_vm11 = vcmp.eq.s32.totalorder %v663_v21, 1 }
  0x2b   :  { %234 = vrot.lane.b32.xlu1 %v577_v14, %s507_s19  ;;  %232 = vrot.lane.b32.xlu0 %v564_v11, %s507_s19  ;;  %vm119_vm8 = vcmp.eq.s32.totalorder %v652_v18, 1  ;;  %vm120_vm10 = vcmp.eq.s32.totalorder %v659_v20, 1  ;;  %vm112_vm6 = vcmp.eq.s32.totalorder %v650_v3, 0  ;;  %vm113_vm15 = vcmp.eq.s32.totalorder %v646_v0, 0 }
  0x2f   :  { %196 = vrot.lane.b32.xlu1 %v569_v12, %s508_s20  ;;  %194 = vrot.lane.b32.xlu0 %v557_v10, %s508_s20 }
  0x33   :  { %200 = vrot.lane.b32.xlu1 %v564_v11, %s508_s20  ;;  %198 = vrot.lane.b32.xlu0 %v552_v9, %s508_s20 }
  0x37   :  { %178 = vrot.lane.b32.xlu1 %v557_v10, %s509_s21  ;;  %202 = vrot.lane.b32.xlu0 %v577_v14, %s508_s20 }
  0x3b   :  { %182 = vrot.lane.b32.xlu1 %v552_v9, %s509_s21  ;;  %180 = vrot.lane.b32.xlu0 %v569_v12, %s509_s21 }
  0x3f   :  { %186 = vrot.lane.b32.xlu1 %v577_v14, %s509_s21  ;;  %184 = vrot.lane.b32.xlu0 %v564_v11, %s509_s21 }
  0x43   :  { %164 = vrot.lane.b32.xlu1 %v569_v12, %s510_s22  ;;  %162 = vrot.lane.b32.xlu0 %v557_v10, %s510_s22 }
  0x47   :  { %168 = vrot.lane.b32.xlu1 %v564_v11, %s510_s22  ;;  %166 = vrot.lane.b32.xlu0 %v552_v9, %s510_s22 }
  0x4b   :  { %170 = vrot.lane.b32.xlu0 %v577_v14, %s510_s22 }
  0x8d   :  { %v622_v30 = vpop.permute.xlu1 %214  ;;  %v624_v31 = vpop.permute.xlu0 %210 }
  0x91   :  { %v629_v35 = vpop.permute.xlu1 %216  ;;  %v631_v36 = vpop.permute.xlu0 %212 }
  0x92   :  { %v224_v27 = vsel %vm220_vm1, %v624_v31, %v631_v36  ;;  %v222_v39 = vsel %vm220_vm1, %v622_v30, %v629_v35 }
  0x95   :  { %v227_v42 = vpop.permute.xlu1 %226  ;;  %v635_v43 = vpop.permute.xlu0 %218 }
  0x96   :  { %v225_v28 = vsel %vm220_vm1, %v635_v43, %v624_v31  ;;  %v221_v44 = vsel %vm220_vm1, %v629_v35, %v635_v43 }
  0x99   :  { %v638_v49 = vpop.permute.xlu1 %230  ;;  %v640_v50 = vpop.permute.xlu0 %228 }
  0x9a   :  { %v240_v24 = vsel %vm236_vm2, %v227_v42, %v640_v50  ;;  %v239_v45 = vsel %vm236_vm2, %v640_v50, %v638_v49 }
  0x9b   :  { %v263_v29 = vsel %vm128_vm3, %v224_v27, %v240_v24 }
  0x9d   :  { %v235_v58 = vpop.permute.xlu1 %234  ;;  %v233_v59 = vpop.permute.xlu0 %232 }
  0x9e   :  { %v241_v25 = vsel %vm236_vm2, %v235_v58, %v227_v42  ;;  %v237_v37 = vsel %vm236_vm2, %v233_v59, %v235_v58  ;;  %v223_v42 = vsel %vm220_vm1, %v631_v36, %v622_v30  ;;  %v238_v46 = vsel %vm236_vm2, %v638_v49, %v233_v59 }
  0x9f   :  { %v262_v34 = vsel %vm882_vm4, %v225_v28, %v241_v25  ;;  %vm188_vm4 = vcmp.lt.s32.totalorder %v600_v15, 127  ;;  %v266_v47 = vsel %vm131_vm13, %v221_v44, %v237_v37  ;;  %vm890_vm1 = vcmp.eq.s32.totalorder %v650_v3, 1 }
  0xa0   :  { %vm891_vm2 = vcmp.eq.s32.totalorder %v652_v18, 3 }
  0xa1   :  { %v197_v16 = vpop.permute.xlu1 %196  ;;  %v195_v17 = vpop.permute.xlu0 %194  ;;  %v264_v53 = vsel %vm891_vm2, %v223_v42, %v239_v45  ;;  %vm114_vm2 = vcmp.eq.s32.totalorder %v652_v18, 0 }
  0xa2   :  { %v208_v26 = vsel %vm204_vm5, %v195_v17, %v197_v16 }
  0xa3   :  { %v268_v38 = vsel %vm123_vm7, %v208_v26, %v263_v29 }
  0xa4   :  { %v273_v35 = vsel %vm884_vm9, %v569_v12, %v268_v38  ;;  %vm885_vm9 = vcmp.eq.s32.totalorder %v663_v21, 0 }
  0xa5   :  { %v201_v22 = vpop.permute.xlu1 %200  ;;  %v199_v23 = vpop.permute.xlu0 %198 }
  0xa6   :  { %v206_v30 = vsel %vm204_vm5, %v199_v23, %v201_v22  ;;  %v207_v36 = vsel %vm204_vm5, %v197_v16, %v199_v23 }
  0xa9   :  { %v179_v32 = vpop.permute.xlu1 %178  ;;  %v203_v33 = vpop.permute.xlu0 %202 }
  0xaa   :  { %v209_v31 = vsel %vm204_vm5, %v203_v33, %v195_v17  ;;  %v205_v40 = vsel %vm204_vm5, %v201_v22, %v203_v33  ;;  %vm892_vm5 = vcmp.eq.s32.totalorder %v659_v20, 3 }
  0xab   :  { %v267_v41 = vsel %vm122_vm12, %v209_v31, %v262_v34  ;;  %v271_v50 = vsel %vm883_vm14, %v205_v40, %v266_v47  ;;  %v265_v54 = vsel %vm892_vm5, %v222_v39, %v238_v46  ;;  %vm894_vm14 = vcmp.eq.s32.totalorder %v659_v20, 2 }
  0xac   :  { %v272_v49 = vsel %vm890_vm1, %v557_v10, %v267_v41  ;;  %vm893_vm1 = vcmp.eq.s32.totalorder %v652_v18, 2  ;;  %v270_v58 = vsel %vm894_vm14, %v206_v30, %v265_v54  ;;  %v276_v61 = vsel %vm121_vm11, %v577_v14, %v271_v50 }
  0xad   :  { %v183_v48 = vpop.permute.xlu1 %182  ;;  %v181_v43 = vpop.permute.xlu0 %180  ;;  %v269_v57 = vsel %vm893_vm1, %v207_v36, %v264_v53  ;;  %vm115_vm5 = vcmp.eq.s32.totalorder %v659_v20, 0  ;;  %v275_v25 = vsel %vm120_vm10, %v564_v11, %v270_v58  ;;  %v243_v34 = vsel %vm128_vm3, %v208_v26, %v224_v27 }
  0xae   :  { %v191_v51 = vsel %vm188_vm4, %v181_v43, %v183_v48  ;;  %v192_v52 = vsel %vm188_vm4, %v179_v32, %v181_v43  ;;  %v274_v24 = vsel %vm119_vm8, %v552_v9, %v269_v57  ;;  %vm895_vm14 = vcmp.eq.s32.totalorder %v652_v18, 3 }
  0xaf   :  { %v277_v55 = vsel %vm112_vm6, %v192_v52, %v272_v49  ;;  %v278_v56 = vsel %vm113_vm15, %v191_v51, %v273_v35  ;;  %v244_v37 = vsel %vm895_vm14, %v207_v36, %v223_v42  ;;  %vm896_vm1 = vcmp.eq.s32.totalorder %v650_v3, 3 }
  0xb0   :  { %v297_v59 = vcombine.low %v277_v55, %v278_v56  ;;  %v242_v38 = vsel %vm896_vm1, %v209_v31, %v225_v28  ;;  %v248_v27 = vsel %vm123_vm7, %v569_v12, %v243_v34  ;;  %vm898_vm3 = vcmp.eq.s32.totalorder %v652_v18, 2 }
  0xb1   :  { %v187_v60 = vpop.permute.xlu1 %186  ;;  %v185_v62 = vpop.permute.xlu0 %184  ;;  %v247_v26 = vsel %vm122_vm12, %v557_v10, %v242_v38  ;;  %v249_v28 = vsel %vm898_vm3, %v552_v9, %v244_v37  ;;  %v246_v31 = vsel %vm131_vm13, %v205_v40, %v221_v44  ;;  %vm899_vm14 = vcmp.eq.s32.totalorder %v650_v3, 1 }
  0xb2   :  { %v305_v63 = vrot.slane %v297_v59, %v655_v19  ;;  %v193_v16 = vsel %vm188_vm4, %v187_v60, %v179_v32  ;;  %v189_v17 = vsel %vm188_vm4, %v185_v62, %v187_v60  ;;  %v190_v22 = vsel %vm188_vm4, %v183_v48, %v185_v62 }
  0xb3   :  { %v281_v23 = vsel %vm885_vm9, %v193_v16, %v276_v61  ;;  %v279_v32 = vsel %vm114_vm2, %v190_v22, %v274_v24  ;;  %v280_v33 = vsel %vm115_vm5, %v189_v17, %v275_v25  ;;  %vm172_vm4 = vcmp.lt.s32.totalorder %v600_v15, 126 }
  0xb4   :  { %v319_v29 = vrot.slane %v281_v23, %v655_v19  ;;  %v298_v41 = vcombine.low %v279_v32, %v280_v33  ;;  %vm897_vm9 = vcmp.eq.s32.totalorder %v659_v20, 3  ;;  %v252_v42 = vsel %vm899_vm14, %v192_v52, %v247_v26 }
  0xb5   :  { %v165_v45 = vpop.permute.xlu1 %164  ;;  %v163_v46 = vpop.permute.xlu0 %162  ;;  %v245_v43 = vsel %vm897_vm9, %v206_v30, %v222_v39  ;;  %vm900_vm9 = vcmp.eq.s32.totalorder %v646_v0, 1  ;;  %v254_v49 = vsel %vm119_vm8, %v190_v22, %v249_v28  ;;  %vm901_vm7 = vcmp.eq.s32.totalorder %v663_v21, 2 }
  0xb6   :  { %v334_v47 = vrot.slane %v319_v29, %v655_v19  ;;  %v312_v48 = vrot.slane %v298_v41, %v655_v19  ;;  %v176_v35 = vsel %vm172_vm4, %v163_v46, %v165_v45  ;;  %v253_v39 = vsel %vm900_vm9, %v191_v51, %v248_v27 }
  0xb7   :  { %v257_v53 = vsel %vm112_vm6, %v176_v35, %v252_v42  ;;  %v251_v55 = vsel %vm901_vm7, %v577_v14, %v246_v31  ;;  %vm902_vm6 = vcmp.eq.s32.totalorder %v659_v20, 2  ;;  %vm903_vm8 = vcmp.eq.s32.totalorder %v663_v21, 0 }
  0xb8   :  { %v320_v30 = vcombine.low %v305_v63, %v312_v48  ;;  %v250_v3 = vsel %vm902_vm6, %v564_v11, %v245_v43  ;;  %v256_v56 = vsel %vm121_vm11, %v193_v16, %v251_v55  ;;  %v282_v0 = vsub.f32 %v257_v53, %v557_v10 }
  0xb9   :  { %v169_v36 = vpop.permute.xlu1 %168  ;;  %v167_v50 = vpop.permute.xlu0 %166  ;;  %v255_v57 = vsel %vm120_vm10, %v189_v17, %v250_v3 }
  0xba   :  { %v174_v54 = vsel %vm172_vm4, %v167_v50, %v169_v36  ;;  %v175_v40 = vsel %vm172_vm4, %v165_v45, %v167_v50  ;;  %v327_v44 = vrot.slane %v320_v30, %v655_v19 }
  0xbb   :  { %v258_v51 = vsel %vm113_vm15, %v175_v40, %v253_v39  ;;  %v259_v52 = vsel %vm114_vm2, %v174_v54, %v254_v49 }
  0xbc   :  { %v335_v58 = vcombine.low %v327_v44, %v334_v47  ;;  %v283_v18 = vsub.f32 %v258_v51, %v569_v12  ;;  %v284_v60 = vsub.f32 %v259_v52, %v552_v9  ;;  %v287_v9 = vmax.f32 %v282_v0, 0.0 }
  0xbd   :  { %v171_v59 = vpop.permute.xlu0 %170 }
  0xbe   :  { %v173_v61 = vsel %vm172_vm4, %v169_v36, %v171_v59  ;;  %v177_v62 = vsel %vm172_vm4, %v171_v59, %v163_v46  ;;  %v337_v63 = vsub.f32 %v547_v8, %v335_v58  ;;  %v288_v23 = vmax.f32 %v283_v18, 0.0 }
  0xbf   :  { %v260_v16 = vsel %vm115_vm5, %v173_v61, %v255_v57  ;;  %v261_v17 = vsel %vm903_vm8, %v177_v62, %v256_v56  ;;  %v289_v24 = vmax.f32 %v284_v60, 0.0 }
  0xc0   :  { %v285_v10 = vsub.f32 %v260_v16, %v564_v11  ;;  %v286_v12 = vsub.f32 %v261_v17, %v577_v14  ;;  %v338_v22 = vmax.f32 %v337_v63, 0.0 }
  0xc2   :  { %v290_v25 = vmax.f32 %v285_v10, 0.0  ;;  %v291_v29 = vmax.f32 %v286_v12, 0.0  ;;  %v343_v15 = vrot.slane %v338_v22, %v139_v5  ;;  %v347_v8 = vrot.slane %v338_v22, %v143_v7 }
  0xc3   :  { %v351_v20 = vrot.slane %v338_v22, %v147_v4  ;;  %v355_v11 = vrot.slane %v338_v22, %v151_v6  ;;  %v359_v14 = vrot.slane %v338_v22, %v155_v13 }
  0xc4   :  { %v365_v21 = vadd.f32 %v343_v15, %v287_v9  ;;  %v366_v32 = vadd.f32 %v347_v8, %v288_v23 }
  0xc5   :  { %v367_v33 = vadd.f32 %v351_v20, %v289_v24  ;;  %v368_v34 = vadd.f32 %v355_v11, %v290_v25  ;;  %v369_v37 = vadd.f32 %v359_v14, %v291_v29 }
  0xc6   :  { %v380_v38 = vcombine.low %v365_v21, %v366_v32 }
  0xc7   :  { %v381_v41 = vcombine.low %v367_v33, %v368_v34  ;;  %v402_v5 = vrot.slane %v369_v37, %v655_v19 }
  0xc8   :  { %v388_v7 = vrot.slane %v380_v38, %v655_v19 }
  0xc9   :  { %v395_v45 = vrot.slane %v381_v41, %v655_v19  ;;  %v417_v4 = vrot.slane %v402_v5, %v655_v19 }
  0xcb   :  { %v403_v46 = vcombine.low %v388_v7, %v395_v45 }
  0xcd   :  { %v410_v6 = vrot.slane %v403_v46, %v655_v19 }
  0xcf   :  { %v418_v13 = vcombine.low %v410_v6, %v417_v4 }
  0xd1   :  { %v420_v47 = vadd.f32 %v418_v13, %v135_v2 }
  0xd3   :  { %421 = vst.msk [vmem:[#allocation5] sm:$0x1f] %vm535_vm0, %v420_v47 }
  0xd4   :  { %489 = shalt.err (!%p486_p12)
}
  0xd5   :  { %s490_s29 = scalar_lea.hbm %s881_s1, 80 }
  0xd6   :  { %p491_p13 = scmp.ne.s32.totalorder %s881_s1, %s490_s29  ;;  %p494_p0 = scmp.lt.u32.totalorder %s490_s29, %s881_s1 }
  0xd8   :  { %p496_p1 = pnand %p494_p0, %p491_p13 }
  0xda   :  { %499 = shalt.err (!%p496_p1)
}
  0xdb   :  { %431 = dma.vmem_to_hbm [thread:$0]  %s429_s24, 80, %s881_s1, [#allocation4]  }
  0xdc   :  { %502 = dma.done.wait [#allocation4], 80  }
  0xdd   :  { %503 = vsyncadd [#allocation4], 4294967216 }
  0xde   :  { %435 = vsyncpa [#allocation3], 1 }
  0xdf   :  { %436 = vsyncpa [#allocation4], 1 }

</bundles_post_ra>
